<compile_context>
chip_gen: v6e
topology: v6e:2x2x1
jax: 0.10.0
libtpu: 0.0.40
codegen_flags: <defaults>
</compile_context>

<pallas_src>
import jax
import jax.numpy as jnp
from jax.experimental import pallas as pl
from jax.experimental.pallas import tpu as pltpu


def _round_up(x, m):
    return (x + m - 1) // m * m


def _cdiv(a, b):
    return -(-a // b)


def _device_kind():
    try:
        return jax.devices()[0].device_kind.lower()
    except Exception:
        return ""


# --------------------------------------------------------------------------
# Kernels
# --------------------------------------------------------------------------

def _resident_kernel(x_ref, w_ref, b_ref, o_ref):
    # x_ref: (tm, K) input dtype; w_ref: (K, tn) bf16 (VMEM-resident across M
    # tiles); b_ref: (1, tn) f32; o_ref: (tm, tn) output dtype.
    x = x_ref[...].astype(w_ref.dtype)          # cast in-kernel (MXU bf16 path)
    acc = jnp.dot(x, w_ref[...], preferred_element_type=jnp.float32)
    o_ref[...] = (acc + b_ref[...]).astype(o_ref.dtype)


def _ktiled_kernel(x_ref, w_ref, b_ref, o_ref, acc_ref):
    # Grid = (m_tiles, k_tiles); reduction axis last; f32 accumulator scratch.
    k = pl.program_id(1)

    @pl.when(k == 0)
    def _init():
        # Fold the bias into the accumulator init (no epilogue add pass).
        acc_ref[...] = jnp.broadcast_to(b_ref[...], acc_ref.shape)

    acc_ref[...] += jnp.dot(x_ref[...].astype(w_ref.dtype), w_ref[...],
                            preferred_element_type=jnp.float32)

    @pl.when(k == pl.num_programs(1) - 1)
    def _store():
        o_ref[...] = acc_ref[...].astype(o_ref.dtype)


# --------------------------------------------------------------------------
# Wrapper
# --------------------------------------------------------------------------

class FlattenHeadPallas:
    """Eval-mode FlattenHead: flatten(-2) -> Linear(fea_num, pred_len) -> Dropout(identity)."""

    def __init__(self, weight, bias, head_dropout=0.0, compute_dtype=jnp.bfloat16,
                 _force_ktiled=False, _tk_cap=2048):
        pred_len, fea_num = weight.shape
        self.pred_len = int(pred_len)
        self.fea_num = int(fea_num)
        self.compute_dtype = compute_dtype
        self.head_dropout = head_dropout          # identity in eval mode
        self.is_v7 = "v7" in _device_kind()

        # ---- N plan: lane-dense; split into 2 parallel blocks on v7x so the
        # second TensorCore gets work even when M is tiny. ----
        n_split = 2 if (self.is_v7 and self.pred_len > 128) else 1
        self.n_tiles = n_split
        self.n_pad = _round_up(self.pred_len, 128 * n_split)
        self.tn = self.n_pad // n_split

        # ---- resident-weight decision (generation-aware VMEM budget; the
        # weight BlockSpec is still double-buffered by the pipeline). ----
        budget = (5 << 20) if self.is_v7 else (10 << 20)
        self.resident = (self.fea_num * self.n_pad * 2 <= budget) and not _force_ktiled

        # ---- one-time weight / bias prep (outside the per-call hot path) ----
        w_t = jnp.asarray(weight, jnp.float32).T                      # (fea_num, pred_len)
        w_t = jnp.pad(w_t, ((0, 0), (0, self.n_pad - self.pred_len)))
        if self.resident:
            self.tk = self.fea_num
            self.k_pad = self.fea_num
            self.k_tiles = 1
        else:
            # Balanced K tiles: overshoot bounded, never ~2x like round_up(fea,tk).
            k128 = _round_up(self.fea_num, 128)
            num_kt = _cdiv(k128, _tk_cap)
            self.tk = _round_up(_cdiv(k128, num_kt), 128)
            self.k_tiles = num_kt
            self.k_pad = num_kt * self.tk
            w_t = jnp.pad(w_t, ((0, self.k_pad - self.fea_num), (0, 0)))
        self.w = w_t.astype(compute_dtype)
        b = jnp.pad(jnp.asarray(bias, jnp.float32), (0, self.n_pad - self.pred_len))
        self.b = b.reshape(1, self.n_pad)

    # ----------------------------------------------------------------------

    def __call__(self, x):
        batch, n_vars, d_model, patch_num = x.shape
        assert d_model * patch_num == self.fea_num
        m = batch * n_vars

        # Glue: flatten(start_dim=-2) == row-major reshape of the last 2 dims.
        # Keep the original dtype -- cast to bf16 happens inside the kernel.
        x_flat = x.reshape(m, self.fea_num)
        xsize = x_flat.dtype.itemsize
        osize = xsize

        # ---- M tile: balanced (no ~2x over-pad), 8-row granularity,
        # generation- and VMEM-aware cap. Partial last tile handled by grid. ----
        k_cols = self.fea_num if self.resident else self.tk
        tm_cap = 256 if self.is_v7 else 512
        tm_vmem = max(8, ((10 << 20) // max(1, 2 * k_cols * xsize)) // 8 * 8)
        tm_cap = max(8, min(tm_cap, tm_vmem))
        if m <= tm_cap:
            tm = _round_up(m, 8)
        else:
            tm = _round_up(_cdiv(m, _cdiv(m, tm_cap)), 8)
        m_tiles = _cdiv(m, tm)

        vmem_cap = (32 << 20) if self.is_v7 else (48 << 20)

        if self.resident:
            # Single K step; weight stays VMEM-resident across the inner M loop.
            grid = (self.n_tiles, m_tiles)
            in_specs = [
                pl.BlockSpec((tm, self.fea_num), lambda j, i: (i, 0)),
                pl.BlockSpec((self.fea_num, self.tn), lambda j, i: (0, j)),
                pl.BlockSpec((1, self.tn), lambda j, i: (0, j)),
            ]
            out_specs = pl.BlockSpec((tm, self.tn), lambda j, i: (i, j))
            scratch_shapes = []
            kernel = _resident_kernel
            semantics = ("parallel", "parallel")
            vmem_est = (2 * tm * self.fea_num * xsize
                        + 2 * self.fea_num * self.tn * 2
                        + 2 * tm * self.tn * osize
                        + self.n_pad * 4 + (1 << 20))
            bytes_accessed = (m * self.fea_num * xsize
                              + self.fea_num * self.n_pad * 2
                              + m * self.n_pad * osize)
        else:
            # Large weight: stream K tiles, f32 accumulator, reduction axis last.
            if self.k_pad != self.fea_num:
                # Zero-pad only the (small) K tail so padded-K never multiplies garbage.
                x_flat = jnp.pad(x_flat, ((0, 0), (0, self.k_pad - self.fea_num)))
            grid = (m_tiles, self.k_tiles)
            in_specs = [
                pl.BlockSpec((tm, self.tk), lambda i, k: (i, k)),
                pl.BlockSpec((self.tk, self.n_pad), lambda i, k: (k, 0)),
                pl.BlockSpec((1, self.n_pad), lambda i, k: (0, 0)),
            ]
            out_specs = pl.BlockSpec((tm, self.n_pad), lambda i, k: (i, 0))
            scratch_shapes = [pltpu.VMEM((tm, self.n_pad), jnp.float32)]
            kernel = _ktiled_kernel
            semantics = ("parallel", "arbitrary")
            vmem_est = (2 * (tm * self.tk * xsize + self.tk * self.n_pad * 2)
                        + 2 * tm * self.n_pad * osize
                        + tm * self.n_pad * 4 + (1 << 20))
            # Weight is re-streamed once per M tile with this grid: count it.
            bytes_accessed = (m * self.k_pad * xsize
                              + m_tiles * self.k_pad * self.n_pad * 2
                              + m * self.n_pad * osize)

        vmem_limit = int(min(vmem_cap, max(16 << 20, int(1.25 * vmem_est))))
        cost = pl.CostEstimate(
            flops=2 * m_tiles * tm * self.k_pad * self.n_pad,
            transcendentals=0,
            bytes_accessed=int(bytes_accessed),
        )

        out = pl.pallas_call(
            kernel,
            out_shape=jax.ShapeDtypeStruct((m, self.n_pad), x.dtype),
            grid_spec=pltpu.PrefetchScalarGridSpec(
                num_scalar_prefetch=0,
                grid=grid,
                in_specs=in_specs,
                out_specs=out_specs,
                scratch_shapes=scratch_shapes,
            ),
            compiler_params=pltpu.CompilerParams(
                dimension_semantics=semantics,
                vmem_limit_bytes=vmem_limit,
            ),
            cost_estimate=cost,
        )(x_flat, self.w, self.b)

        # Dropout is identity in eval mode.
        # TODO(synk): training-mode dropout (pltpu.prng_random_bits mask) if needed.
        out = out[:, :self.pred_len]
        return out.reshape(batch, n_vars, self.pred_len)


# --------------------------------------------------------------------------
# Self-test
# --------------------------------------------------------------------------

def _make_params(key, fea_num, pred_len):
    kw, kb = jax.random.split(key)
    bound = 1.0 / (fea_num ** 0.5)
    weight = jax.random.uniform(kw, (pred_len, fea_num), jnp.float32, -bound, bound)
    bias = jax.random.uniform(kb, (pred_len,), jnp.float32, -bound, bound)
    return weight, bias


def _check(y, x, weight, bias):
    batch, n_vars, d_model, patch_num = x.shape
    fea_num = d_model * patch_num
    # Reference at the same compute precision (bf16 inputs/weight, f32 acc).
    x_bf = x.astype(jnp.bfloat16).astype(jnp.float32)
    w_bf = weight.astype(jnp.bfloat16).astype(jnp.float32)
    ref_bf = x_bf.reshape(batch, n_vars, fea_num) @ w_bf.T + bias
    assert jnp.allclose(y, ref_bf, atol=1e-3, rtol=1e-3)
    # Looser check against full-f32 module semantics (bf16 rounding only).
    ref_f32 = x.reshape(batch, n_vars, fea_num) @ weight.T + bias
    assert jnp.allclose(y, ref_f32, atol=3e-2, rtol=3e-2)


if __name__ == "__main__":
    key = jax.random.PRNGKey(0)
    k1, k2, k3, k4 = jax.random.split(key, 4)

    # ---- Test 1: common case -> resident-weight path (single K step). ----
    batch, n_vars, d_model, patch_num, pred_len = 2, 4, 16, 8, 96
    x1 = jax.random.normal(k1, (batch, n_vars, d_model, patch_num), jnp.float32)
    w1, b1 = _make_params(k2, d_model * patch_num, pred_len)
    head1 = FlattenHeadPallas(w1, b1, head_dropout=0.1)
    y1 = head1(x1)
    jax.block_until_ready(y1)
    assert y1.shape == (batch, n_vars, pred_len)
    _check(y1, x1, w1, b1)

    # ---- Test 2: force the K-tiled path (small shapes, tk cap lowered) with
    # a non-128-multiple fea_num and an M that is not a tile multiple. ----
    batch, n_vars, d_model, patch_num, pred_len = 3, 3, 16, 20, 96
    x2 = jax.random.normal(k3, (batch, n_vars, d_model, patch_num), jnp.float32)
    w2, b2 = _make_params(k4, d_model * patch_num, pred_len)
    head2 = FlattenHeadPallas(w2, b2, head_dropout=0.1, _force_ktiled=True, _tk_cap=128)
    y2 = head2(x2)
    jax.block_until_ready(y2)
    assert y2.shape == (batch, n_vars, pred_len)
    _check(y2, x2, w2, b2)

    print("KERNEL_OK")
</pallas_src>

<mosaic_0001>
module attributes {stable_mosaic.version = 11 : i64} {
  func.func @_resident_kernel(%arg0: i32, %arg1: i32, %arg2: memref<8x128xf32, #tpu.memory_space<vmem>>, %arg3: memref<128x128xbf16, #tpu.memory_space<vmem>>, %arg4: memref<1x128xf32, #tpu.memory_space<vmem>>, %arg5: memref<8x128xf32, #tpu.memory_space<vmem>>) attributes {dimension_semantics = [#tpu.dimension_semantics<parallel>, #tpu.dimension_semantics<parallel>], iteration_bounds = array<i64: 1, 1>, scalar_prefetch = 0 : i64, scratch_operands = 0 : i64, tpu.core_type = #tpu.core_type<tc>, window_params = [{transform_indices = @transform_0, window_bounds = array<i64: 8, 128>}, {transform_indices = @transform_1, window_bounds = array<i64: 128, 128>}, {transform_indices = @transform_2, window_bounds = array<i64: 1, 128>}, {transform_indices = @transform_3, window_bounds = array<i64: 8, 128>}]} {
    %c0 = arith.constant 0 : index
    %c0_0 = arith.constant 0 : index
    %0 = vector.load %arg2[%c0, %c0_0] : memref<8x128xf32, #tpu.memory_space<vmem>>, vector<8x128xf32>
    %1 = arith.truncf %0 : vector<8x128xf32> to vector<8x128xbf16>
    %c0_1 = arith.constant 0 : index
    %c0_2 = arith.constant 0 : index
    %2 = vector.load %arg3[%c0_1, %c0_2] : memref<128x128xbf16, #tpu.memory_space<vmem>>, vector<128x128xbf16>
    %cst = arith.constant dense<0.000000e+00> : vector<8x128xf32>
    %3 = tpu.matmul %1, %2, %cst {dimension_numbers = #tpu.dot_dimension_numbers<[1], [0], [0], [1], [0, 0, 1, 1], [], []>} : vector<8x128xbf16>, vector<128x128xbf16>, vector<8x128xf32> -> vector<8x128xf32>
    %c0_3 = arith.constant 0 : index
    %c0_4 = arith.constant 0 : index
    %4 = vector.load %arg4[%c0_3, %c0_4] : memref<1x128xf32, #tpu.memory_space<vmem>>, vector<1x128xf32>
    %5 = vector.broadcast %4 : vector<1x128xf32> to vector<8x128xf32>
    %6 = arith.addf %3, %5 : vector<8x128xf32>
    %c0_5 = arith.constant 0 : index
    %c0_6 = arith.constant 0 : index
    %7 = vector.load %arg5[%c0_5, %c0_6] : memref<8x128xf32, #tpu.memory_space<vmem>>, vector<8x128xf32>
    tpu.vector_store %arg5[%c0_5, %c0_6], %6 {strides = array<i32>} : memref<8x128xf32, #tpu.memory_space<vmem>>, vector<8x128xf32>,
    return
  }
  func.func @transform_0(%arg0: i32, %arg1: i32) -> (i32, i32) {
    %c0_i32 = arith.constant 0 : i32
    %c0_i32_0 = arith.constant 0 : i32
    return %arg1, %c0_i32 : i32, i32
  }
  func.func @transform_1(%arg0: i32, %arg1: i32) -> (i32, i32) {
    %c0_i32 = arith.constant 0 : i32
    %c0_i32_0 = arith.constant 0 : i32
    return %c0_i32, %arg0 : i32, i32
  }
  func.func @transform_2(%arg0: i32, %arg1: i32) -> (i32, i32) {
    %c0_i32 = arith.constant 0 : i32
    %c0_i32_0 = arith.constant 0 : i32
    return %c0_i32, %arg0 : i32, i32
  }
  func.func @transform_3(%arg0: i32, %arg1: i32) -> (i32, i32) {
    %c0_i32 = arith.constant 0 : i32
    return %arg1, %arg0 : i32, i32
  }
}

</mosaic_0001>

<bundles_post_ra>
// kernel: tpu_custom_call.1
= control target key start
LH: loop header
LB: loop body
LE: loop exit
PB: predicated region body
PF: predicated region fallthrough
CT: control target
= control target key end

     0   :  { %8 = vsyncpa [#allocation3], 0  ;;  %s330_s0 = inlined_call_operand.hbm [shape: f32[8,128], index: 0, kind: input, shape index: {}]   ;;  %s331_s1 = inlined_call_operand.hbm [shape: bf16[128,128], index: 1, kind: input, shape index: {}]   ;;  %s332_s2 = inlined_call_operand.vmem [shape: f32[1,128], index: 2, kind: input, shape index: {}]   ;;  %s333_s3 = inlined_call_operand.hbm [shape: f32[8,128], index: 3, kind: output, shape index: {}]  }
   0x1   :  { %9 = vsyncpa [#allocation6], 0 }
   0x2   :  { %10 = vsyncpa [#allocation4], 0  ;;  %s291_s12 = smov [#allocation2]   ;;  %s292_s14 = smov [#allocation5]  }
   0x3   :  { %s17_s13 = sshll.u32 %s291_s12, 4  ;;  %s26_s15 = sshll.u32 %s292_s14, 4  ;;  %s18_s13 = int_to_ptr.vmem [resolvable:$true] %s17_s13  ;;  %s27_s15 = int_to_ptr.vmem [resolvable:$true] %s26_s15 }
   0x4   :  { %s233_s16 = scalar_lea.vmem %s18_s13, 128  ;;  %p238_p1 = scmp.lt.s32.totalorder %s18_s13, %s18_s13 }
   0x5   :  { %p234_p0 = scmp.ne.s32.totalorder %s18_s13, %s233_s16  ;;  %p239_p2 = scmp.lt.s32.totalorder %s233_s16, %s233_s16 }
   0x7   :  { %p240_p3 = por %p239_p2, %p238_p1 }
   0x9   :  { %p241_p4 = pnand %p240_p3, %p234_p0 }
   0xb   :  { %244 = shalt.err (!%p241_p4)
}
   0xc   :  { %20 = dma.hbm_to_vmem [thread:$0]  %s330_s0, 128, %s18_s13, [#allocation3]  }
   0xd   :  { %s253_s19 = scalar_lea.vmem %s27_s15, 1024  ;;  %p258_p6 = scmp.lt.s32.totalorder %s27_s15, %s27_s15 }
   0xe   :  { %p254_p5 = scmp.ne.s32.totalorder %s27_s15, %s253_s19  ;;  %p259_p7 = scmp.lt.s32.totalorder %s253_s19, %s253_s19 }
  0x10   :  { %p260_p8 = por %p259_p7, %p258_p6 }
  0x12   :  { %p261_p9 = pnand %p260_p8, %p254_p5 }
  0x14   :  { %264 = shalt.err (!%p261_p9)
}
  0x15   :  { %s293_s20 = smov 64   ;;  %s294_s21 = smov 4  }
  0x16   :  { %32 = dma.hbm_to_vmem [thread:$0]  %s331_s1, 1024, %s27_s15, [#allocation6], %s293_s20, %s293_s20, %s294_s21  }
  0x17   :  { %285 = dma.done.wait [#allocation3], 128  }
  0x18   :  { %286 = vsyncadd [#allocation3], 4294967168 }
  0x19   :  { %287 = dma.done.wait [#allocation6], 1024  }
  0x1a   :  { %288 = vsyncadd [#allocation6], 4294966272  ;;  %v295_v0 = vmov 0.0   ;;  %vm296_vm0 = vmmov 0   ;;  %v217_v1 = vld [vmem:[#allocation5 + $0x38] sm:$0xff]   ;;  %v218_v2 = vld [vmem:[#allocation5 + $0x30] sm:$0xff]  }
  0x1b   :  { %190 = vmatprep.subr.bf16.mxu0 %v295_v0  ;;  %206 = vmatprep.mubr.msk.bf16.mxu0 %vm296_vm0, %v295_v0  ;;  %v219_v3 = vld [vmem:[#allocation5 + $0x28] sm:$0xff]   ;;  %v220_v4 = vld [vmem:[#allocation5 + $0x20] sm:$0xff]   ;;  %v221_v5 = vld [vmem:[#allocation5 + $0x18] sm:$0xff]   ;;  %s297_s24 = smov [#allocation7]  }
  0x1c   :  { %191 = vmatpush3.bf16.msra.mxu0 %v217_v1  ;;  %v222_v6 = vld [vmem:[#allocation5 + $0x10] sm:$0xff]   ;;  %v223_v7 = vld [vmem:[#allocation5 + $0x8] sm:$0xff]   ;;  %v224_v8 = vld [vmem:[#allocation5] sm:$0xff]   ;;  %s162_s25 = sshll.u32 %s297_s24, 4  ;;  %s163_s25 = int_to_ptr.vmem [resolvable:$true] %s162_s25 }
  0x1d   :  { %192 = vmatprep.subr.bf16.mxu0 %v295_v0  ;;  %v42_v9 = vld [vmem:[#allocation2] sm:$0xff]  ;;  %s265_s26 = scalar_lea.vmem %s163_s25, 128  ;;  %p270_p11 = scmp.lt.s32.totalorder %s163_s25, %s163_s25 }
  0x1e   :  { %v43_v10 = vpack.c.bf16 %v42_v9, %v42_v9  ;;  %v172_v11 = vld [vmem:[%s332_s2] ss:$0 sm:$0xff]  ;;  %p266_p10 = scmp.ne.s32.totalorder %s163_s25, %s265_s26  ;;  %p271_p12 = scmp.lt.s32.totalorder %s265_s26, %s265_s26 }
  0x20   :  { %193 = vmatpush3.bf16.msra.mxu0 %v218_v2  ;;  %p272_p13 = por %p271_p12, %p270_p11 }
  0x21   :  { %194 = vmatprep.subr.bf16.mxu0 %v295_v0 }
  0x22   :  { %p273_p0 = pnand %p272_p13, %p266_p10 }
  0x24   :  { %195 = vmatpush3.bf16.msra.mxu0 %v219_v3 }
  0x25   :  { %196 = vmatprep.subr.bf16.mxu0 %v295_v0 }
  0x28   :  { %197 = vmatpush3.bf16.msra.mxu0 %v220_v4 }
  0x29   :  { %198 = vmatprep.subr.bf16.mxu0 %v295_v0 }
  0x2c   :  { %199 = vmatpush3.bf16.msra.mxu0 %v221_v5 }
  0x2d   :  { %200 = vmatprep.subr.bf16.mxu0 %v295_v0 }
  0x30   :  { %201 = vmatpush3.bf16.msra.mxu0 %v222_v6 }
  0x31   :  { %202 = vmatprep.subr.bf16.mxu0 %v295_v0 }
  0x34   :  { %203 = vmatpush3.bf16.msra.mxu0 %v223_v7 }
  0x35   :  { %204 = vmatprep.subr.bf16.mxu0 %v295_v0 }
  0x38   :  { %205 = vmatpush3.bf16.msra.mxu0 %v224_v8 }
  0x3b   :  { %207 = vmatmul.mubr.bf16.vlgmr.msra.gmra.mxu0 %v43_v10 }
  0xfb   :  { %v149_v12 = vpop.f32.mrf.mxu0 }
  0xfc   :  { %v150_v13 = vadd.f32 %v172_v11, %v149_v12 }
  0xfd   :  { %v208_v14 = vpop.f32.mrf.mxu0 }
  0xfe   :  { %155 = vst [vmem:[#allocation7] sm:$0xff] %v150_v13 }
  0xff   :  { %v152_v15 = vpop.f32.mrf.mxu0 }
 0x100   :  { %276 = shalt.err (!%p273_p0)
}
 0x101   :  { %165 = dma.vmem_to_hbm [thread:$0]  %s163_s25, 128, %s333_s3, [#allocation4]   ;;  %v209_v16 = vpop.f32.mrf.mxu0 }
 0x102   :  { %289 = dma.done.wait [#allocation4], 128  }
 0x103   :  { %290 = vsyncadd [#allocation4], 4294967168 }
 0x104   :  { %169 = vsyncpa [#allocation3], 1 }
 0x105   :  { %170 = vsyncpa [#allocation6], 1 }
 0x106   :  { %171 = vsyncpa [#allocation4], 1 }

</bundles_post_ra>
